<compile_context>
chip_gen: v7x
topology: tpu7x:2x2x1
jax: 0.10.0
libtpu: 0.0.40
codegen_flags: <defaults>
</compile_context>

<pallas_src>
import functools

import jax
import jax.numpy as jnp
from jax.experimental import pallas as pl
from jax.experimental.pallas import tpu as pltpu

NUM_CLASSES = 20


def _round_up(x, m):
    return ((x + m - 1) // m) * m


def _isomax_kernel(feat_ref, tgt_ref, protoT_ref, psq_ref, nscale_ref,
                   out_ref, *, total_b, tile_b, steps_per_part):
    p_idx = pl.program_id(0)          # partial-sum index ("parallel")
    s_idx = pl.program_id(1)          # reduction step within the partial

    @pl.when(s_idx == 0)
    def _():
        out_ref[...] = jnp.zeros_like(out_ref)

    x = feat_ref[...]                                         # (TB, D) native dtype
    xf = x.astype(jnp.float32)                                # f32 only for row norms

    # --- fused F.normalize(output, dim=1): never materialize xn ---
    sq = jnp.sum(xf * xf, axis=-1, keepdims=True)             # (TB, 1)  ||x||^2
    inv = jax.lax.rsqrt(jnp.maximum(sq, 1e-24))                # (TB, 1)  1/max(||x||,1e-12)
    xnsq = sq * (inv * inv)                                    # (TB, 1)  ||xn||^2 (eps-exact)
    w = inv + inv                                              # (TB, 1)  2/max(||x||,1e-12)

    # --- cross term on the MXU, in the features' native dtype ---
    u = jnp.dot(x, protoT_ref[...],
                preferred_element_type=jnp.float32)            # (TB, K)

    # --- |scale| * cdist(xn, prototypes) via squared-norm expansion ---
    d2 = jnp.maximum(xnsq + psq_ref[...] - u * w, 0.0)         # (TB, K)
    logits = nscale_ref[...] * jnp.sqrt(d2)                    # -|scale| * dist

    # --- -log softmax(logits)[target], numerically stable ---
    m = jnp.max(logits, axis=-1, keepdims=True)
    lse = m + jnp.log(jnp.sum(jnp.exp(logits - m), axis=-1, keepdims=True))
    t = tgt_ref[...]                                           # (TB, 1) int32
    cls_iota = jax.lax.broadcasted_iota(jnp.int32, logits.shape, 1)
    logit_t = jnp.sum(jnp.where(cls_iota == t, logits, 0.0),
                      axis=-1, keepdims=True)                  # (TB, 1)
    nll = lse - logit_t                                        # (TB, 1)

    # Mask rows past the true batch (partial last tile, VMEM padding, or a
    # clamped phantom tile from the parallel split), then reduce to a scalar
    # partial and accumulate into the resident output block.
    tile_idx = p_idx * steps_per_part + s_idx
    row = tile_idx * tile_b + jax.lax.broadcasted_iota(jnp.int32, nll.shape, 0)
    partial = jnp.sum(jnp.where(row < total_b, nll, 0.0), keepdims=True)  # (1, 1)
    out_ref[...] += partial


def isotropy_maximization_loss(features, targets, prototypes, distance_scale,
                               *, tile_b=None, num_partials=None,
                               vmem_limit_bytes=32 * 1024 * 1024):
    """features: (B, D) float32/bfloat16; targets: (B,) int; prototypes: (K, D);
    distance_scale: scalar. Returns the scalar EnhancedIsotropyMaximizationLoss."""
    b, d = features.shape
    k, d2 = prototypes.shape
    assert d == d2, "prototype feature dim must match features"

    feat_dtype = features.dtype
    if tile_b is None:
        # VMEM bytes per row: feature row + lane-padded (x,128) int32 target row.
        bytes_per_row = d * feat_dtype.itemsize + 128 * 4
        budget = 8 * 1024 * 1024                       # double-buffered input budget
        tile_b = max(8, budget // (2 * bytes_per_row))
        tile_b = min(tile_b, 8192, _round_up(b, 8))
    tile_b = max(8, (tile_b // 8) * 8)

    nblocks = pl.cdiv(b, tile_b)
    if num_partials is None:
        num_partials = 2 if nblocks >= 2 else 1        # lets v7x use both TCs
    num_partials = max(1, min(num_partials, nblocks))
    steps_per_part = pl.cdiv(nblocks, num_partials)

    def row_map(pi, si):
        # Clamp phantom tiles (uneven split) into range; they are masked in-kernel.
        return (jnp.minimum(pi * steps_per_part + si, nblocks - 1), 0)

    proto_f32 = prototypes.astype(jnp.float32)
    proto_t = jnp.transpose(proto_f32).astype(feat_dtype)     # (D, K) — MXU-native dtype
    psq = jnp.sum(proto_f32 * proto_f32, axis=-1)[None, :]    # (1, K)  ||p||^2 (f32)
    nscale = (-jnp.abs(jnp.asarray(distance_scale, jnp.float32))).reshape(1, 1)
    tgt = targets.astype(jnp.int32).reshape(b, 1)

    kernel = functools.partial(_isomax_kernel, total_b=b, tile_b=tile_b,
                               steps_per_part=steps_per_part)

    partials = pl.pallas_call(
        kernel,
        out_shape=jax.ShapeDtypeStruct((num_partials, 1), jnp.float32),
        grid_spec=pltpu.PrefetchScalarGridSpec(
            num_scalar_prefetch=0,
            grid=(num_partials, steps_per_part),
            in_specs=[
                pl.BlockSpec((tile_b, d), row_map),            # feature row tile
                pl.BlockSpec((tile_b, 1), row_map),            # target tile
                pl.BlockSpec((d, k), lambda pi, si: (0, 0)),   # prototypes^T (resident)
                pl.BlockSpec((1, k), lambda pi, si: (0, 0)),   # ||prototype||^2
                pl.BlockSpec((1, 1), lambda pi, si: (0, 0)),   # -|distance_scale|
            ],
            out_specs=pl.BlockSpec((1, 1), lambda pi, si: (pi, 0)),
        ),
        compiler_params=pltpu.CompilerParams(
            dimension_semantics=("parallel", "arbitrary"),
            vmem_limit_bytes=vmem_limit_bytes,
        ),
    )(features, tgt, proto_t, psq, nscale)

    return jnp.sum(partials) / b


def _reference(features, targets, prototypes, distance_scale):
    # Pure-JAX mirror of the PyTorch forward.
    x = features.astype(jnp.float32)
    xn = x / jnp.maximum(jnp.linalg.norm(x, axis=1, keepdims=True), 1e-12)
    diff = xn[:, None, :] - prototypes[None, :, :].astype(jnp.float32)
    dist = jnp.abs(jnp.asarray(distance_scale, jnp.float32)) * jnp.sqrt(
        jnp.sum(diff * diff, axis=-1))
    logits = -dist
    logp = jax.nn.log_softmax(logits, axis=-1)
    lp_t = jnp.take_along_axis(logp, targets[:, None].astype(jnp.int32), axis=-1)[:, 0]
    return -jnp.mean(lp_t)


if __name__ == "__main__":
    key = jax.random.PRNGKey(0)
    k1, k2, k3, k4, k5, k6, k7, k8 = jax.random.split(key, 8)

    D = 128                      # model feature_dim
    K = NUM_CLASSES              # 20 class prototypes (nn.Parameter)

    prototypes = jax.random.normal(k3, (K, D), dtype=jnp.float32)
    distance_scale = jnp.float32(-1.5)   # exercises abs(); module init is 1.0

    # Case 1: small batch, single tile, single partial.
    B1 = 16
    feats1 = jax.random.normal(k1, (B1, D), dtype=jnp.float32)
    tgts1 = jax.random.randint(k2, (B1,), 0, K, dtype=jnp.int32)
    loss1 = isotropy_maximization_loss(feats1, tgts1, prototypes, distance_scale)
    jax.block_until_ready(loss1)
    ref1 = _reference(feats1, tgts1, prototypes, distance_scale)
    assert jnp.allclose(loss1, ref1, rtol=1e-3, atol=1e-3), (loss1, ref1)

    # Case 2: multi-step grid (2 partials x 2 steps) with a masked partial tile.
    B2 = 200
    feats2 = jax.random.normal(k4, (B2, D), dtype=jnp.float32)
    tgts2 = jax.random.randint(k5, (B2,), 0, K, dtype=jnp.int32)
    loss2 = isotropy_maximization_loss(feats2, tgts2, prototypes, distance_scale,
                                       tile_b=64)
    jax.block_until_ready(loss2)
    ref2 = _reference(feats2, tgts2, prototypes, distance_scale)
    assert jnp.allclose(loss2, ref2, rtol=1e-3, atol=1e-3), (loss2, ref2)

    # Case 3: odd tile count -> clamped phantom tile on the parallel split.
    B3 = 136
    feats3 = jax.random.normal(k6, (B3, D), dtype=jnp.float32)
    tgts3 = jax.random.randint(k7, (B3,), 0, K, dtype=jnp.int32)
    loss3 = isotropy_maximization_loss(feats3, tgts3, prototypes, distance_scale,
                                       tile_b=64)
    jax.block_until_ready(loss3)
    ref3 = _reference(feats3, tgts3, prototypes, distance_scale)
    assert jnp.allclose(loss3, ref3, rtol=1e-3, atol=1e-3), (loss3, ref3)

    # Case 4: bf16 features go to the MXU natively (softmax math stays f32).
    B4 = 64
    feats4 = jax.random.normal(k8, (B4, D), dtype=jnp.float32).astype(jnp.bfloat16)
    tgts4 = jax.random.randint(k2, (B4,), 0, K, dtype=jnp.int32)
    loss4 = isotropy_maximization_loss(feats4, tgts4, prototypes, distance_scale)
    jax.block_until_ready(loss4)
    ref4 = _reference(feats4, tgts4, prototypes, distance_scale)
    assert jnp.allclose(loss4, ref4, rtol=2e-2, atol=2e-2), (loss4, ref4)

    print("KERNEL_OK")
</pallas_src>

<mosaic_0001>
module attributes {stable_mosaic.version = 11 : i64} {
  func.func @_isomax_kernel(%arg0: i32, %arg1: i32, %arg2: memref<16x128xf32, #tpu.memory_space<vmem>>, %arg3: memref<16x1xi32, #tpu.memory_space<vmem>>, %arg4: memref<128x20xf32, #tpu.memory_space<vmem>>, %arg5: memref<1x20xf32, #tpu.memory_space<vmem>>, %arg6: memref<1x1xf32, #tpu.memory_space<vmem>>, %arg7: memref<1x1xf32, #tpu.memory_space<vmem>>) attributes {dimension_semantics = [#tpu.dimension_semantics<parallel>, #tpu.dimension_semantics<arbitrary>], iteration_bounds = array<i64: 1, 1>, scalar_prefetch = 0 : i64, scratch_operands = 0 : i64, tpu.core_type = #tpu.core_type<tc>, window_params = [{transform_indices = @transform_0, window_bounds = array<i64: 16, 128>}, {transform_indices = @transform_1, window_bounds = array<i64: 16, 1>}, {pipeline_mode = #tpu.pipeline_mode<synchronous>, transform_indices = @transform_2, window_bounds = array<i64: 128, 20>}, {pipeline_mode = #tpu.pipeline_mode<synchronous>, transform_indices = @transform_3, window_bounds = array<i64: 1, 20>}, {pipeline_mode = #tpu.pipeline_mode<synchronous>, transform_indices = @transform_4, window_bounds = array<i64: 1, 1>}, {transform_indices = @transform_5, window_bounds = array<i64: 1, 1>}]} {
    %c0_i32 = arith.constant 0 : i32
    %0 = arith.cmpi eq, %arg1, %c0_i32 : i32
    %1 = arith.extui %0 : i1 to i32
    %c0_i32_0 = arith.constant 0 : i32
    %2 = arith.cmpi ne, %1, %c0_i32_0 : i32
    scf.if %2 {
      %cst_24 = arith.constant 0.000000e+00 : f32
      %64 = vector.broadcast %cst_24 : f32 to vector<1x1xf32>
      %c0_25 = arith.constant 0 : index
      %c0_26 = arith.constant 0 : index
      %65 = vector.load %arg7[%c0_25, %c0_26] : memref<1x1xf32, #tpu.memory_space<vmem>>, vector<1x1xf32>
      tpu.vector_store %arg7[%c0_25, %c0_26], %64 {strides = array<i32>} : memref<1x1xf32, #tpu.memory_space<vmem>>, vector<1x1xf32>,
    } else {
    }
    %c0 = arith.constant 0 : index
    %c0_1 = arith.constant 0 : index
    %3 = vector.load %arg2[%c0, %c0_1] : memref<16x128xf32, #tpu.memory_space<vmem>>, vector<16x128xf32>
    %4 = arith.mulf %3, %3 : vector<16x128xf32>
    %cst = arith.constant dense<0.000000e+00> : vector<16xf32>
    %5 = vector.multi_reduction <add>, %4, %cst [1] : vector<16x128xf32> to vector<16xf32>
    %6 = vector.shape_cast %5 : vector<16xf32> to vector<16x1xf32>
    %cst_2 = arith.constant 1.000000e-24 : f32
    %7 = vector.broadcast %cst_2 : f32 to vector<16x1xf32>
    %8 = arith.maximumf %6, %7 : vector<16x1xf32>
    %9 = math.rsqrt %8 : vector<16x1xf32>
    %10 = arith.mulf %9, %9 : vector<16x1xf32>
    %11 = arith.mulf %6, %10 : vector<16x1xf32>
    %12 = arith.addf %9, %9 : vector<16x1xf32>
    %c0_3 = arith.constant 0 : index
    %c0_4 = arith.constant 0 : index
    %13 = vector.load %arg4[%c0_3, %c0_4] : memref<128x20xf32, #tpu.memory_space<vmem>>, vector<128x20xf32>
    %cst_5 = arith.constant dense<0.000000e+00> : vector<16x20xf32>
    %14 = tpu.matmul %3, %13, %cst_5 {dimension_numbers = #tpu.dot_dimension_numbers<[1], [0], [0], [1], [0, 0, 1, 1], [], []>} : vector<16x128xf32>, vector<128x20xf32>, vector<16x20xf32> -> vector<16x20xf32>
    %c0_6 = arith.constant 0 : index
    %c0_7 = arith.constant 0 : index
    %15 = vector.load %arg5[%c0_6, %c0_7] : memref<1x20xf32, #tpu.memory_space<vmem>>, vector<1x20xf32>
    %16 = vector.broadcast %11 : vector<16x1xf32> to vector<16x20xf32>
    %17 = vector.broadcast %15 : vector<1x20xf32> to vector<16x20xf32>
    %18 = arith.addf %16, %17 : vector<16x20xf32>
    %19 = vector.broadcast %12 : vector<16x1xf32> to vector<16x20xf32>
    %20 = arith.mulf %14, %19 : vector<16x20xf32>
    %21 = arith.subf %18, %20 : vector<16x20xf32>
    %cst_8 = arith.constant 0.000000e+00 : f32
    %22 = vector.broadcast %cst_8 : f32 to vector<16x20xf32>
    %23 = arith.maximumf %21, %22 : vector<16x20xf32>
    %c0_9 = arith.constant 0 : index
    %c0_10 = arith.constant 0 : index
    %24 = vector.load %arg6[%c0_9, %c0_10] : memref<1x1xf32, #tpu.memory_space<vmem>>, vector<1x1xf32>
    %25 = math.sqrt %23 : vector<16x20xf32>
    %26 = vector.broadcast %24 : vector<1x1xf32> to vector<16x20xf32>
    %27 = arith.mulf %26, %25 : vector<16x20xf32>
    %cst_11 = arith.constant dense<0xFF800000> : vector<16xf32>
    %28 = vector.multi_reduction <maximumf>, %27, %cst_11 [1] : vector<16x20xf32> to vector<16xf32>
    %29 = vector.shape_cast %28 : vector<16xf32> to vector<16x1xf32>
    %30 = vector.broadcast %29 : vector<16x1xf32> to vector<16x20xf32>
    %31 = arith.subf %27, %30 : vector<16x20xf32>
    %32 = math.exp %31 : vector<16x20xf32>
    %cst_12 = arith.constant dense<0.000000e+00> : vector<16xf32>
    %33 = vector.multi_reduction <add>, %32, %cst_12 [1] : vector<16x20xf32> to vector<16xf32>
    %34 = vector.shape_cast %33 : vector<16xf32> to vector<16x1xf32>
    %35 = math.log %34 : vector<16x1xf32>
    %36 = arith.addf %29, %35 : vector<16x1xf32>
    %c0_13 = arith.constant 0 : index
    %c0_14 = arith.constant 0 : index
    %37 = vector.load %arg3[%c0_13, %c0_14] : memref<16x1xi32, #tpu.memory_space<vmem>>, vector<16x1xi32>
    %38 = tpu.iota {dimensions = array<i32: 1>} : vector<16x20xi32>
    %39 = vector.broadcast %37 : vector<16x1xi32> to vector<16x20xi32>
    %40 = arith.cmpi eq, %38, %39 : vector<16x20xi32>
    %cst_15 = arith.constant 0.000000e+00 : f32
    %41 = vector.broadcast %cst_15 : f32 to vector<16x20xf32>
    %42 = arith.select %40, %27, %41 : vector<16x20xi1>, vector<16x20xf32>
    %cst_16 = arith.constant dense<0.000000e+00> : vector<16xf32>
    %43 = vector.multi_reduction <add>, %42, %cst_16 [1] : vector<16x20xf32> to vector<16xf32>
    %44 = vector.shape_cast %43 : vector<16xf32> to vector<16x1xf32>
    %45 = arith.subf %36, %44 : vector<16x1xf32>
    %c1_i32 = arith.constant 1 : i32
    %46 = arith.muli %arg0, %c1_i32 : i32
    %47 = arith.addi %46, %arg1 : i32
    %c16_i32 = arith.constant 16 : i32
    %48 = arith.muli %47, %c16_i32 : i32
    %49 = tpu.iota {dimensions = array<i32: 0>} : vector<16x1xi32>
    %50 = vector.broadcast %48 : i32 to vector<16x1xi32>
    %51 = arith.addi %50, %49 : vector<16x1xi32>
    %c16_i32_17 = arith.constant 16 : i32
    %52 = vector.broadcast %c16_i32_17 : i32 to vector<16x1xi32>
    %53 = arith.cmpi slt, %51, %52 : vector<16x1xi32>
    %cst_18 = arith.constant 0.000000e+00 : f32
    %54 = vector.broadcast %cst_18 : f32 to vector<16x1xf32>
    %55 = arith.select %53, %45, %54 : vector<16x1xi1>, vector<16x1xf32>
    %56 = vector.shape_cast %55 : vector<16x1xf32> to vector<1x16x1xf32>
    %cst_19 = arith.constant dense<0.000000e+00> : vector<1xf32>
    %57 = vector.multi_reduction <add>, %56, %cst_19 [1, 2] : vector<1x16x1xf32> to vector<1xf32>
    %58 = vector.shape_cast %57 : vector<1xf32> to vector<1x1x1xf32>
    %59 = vector.extract %58[0, 0, 0] : f32 from vector<1x1x1xf32>
    %60 = vector.broadcast %59 : f32 to vector<1x1xf32>
    %c0_20 = arith.constant 0 : index
    %c0_21 = arith.constant 0 : index
    %61 = vector.load %arg7[%c0_20, %c0_21] : memref<1x1xf32, #tpu.memory_space<vmem>>, vector<1x1xf32>
    %62 = arith.addf %61, %60 : vector<1x1xf32>
    %c0_22 = arith.constant 0 : index
    %c0_23 = arith.constant 0 : index
    %63 = vector.load %arg7[%c0_22, %c0_23] : memref<1x1xf32, #tpu.memory_space<vmem>>, vector<1x1xf32>
    tpu.vector_store %arg7[%c0_22, %c0_23], %62 {strides = array<i32>} : memref<1x1xf32, #tpu.memory_space<vmem>>, vector<1x1xf32>,
    return
  }
  func.func @transform_0(%arg0: i32, %arg1: i32) -> (i32, i32) {
    %c1_i32 = arith.constant 1 : i32
    %0 = arith.muli %arg0, %c1_i32 : i32
    %1 = arith.addi %0, %arg1 : i32
    %c0_i32 = arith.constant 0 : i32
    %2 = arith.minsi %1, %c0_i32 : i32
    %c0_i32_0 = arith.constant 0 : i32
    %c0_i32_1 = arith.constant 0 : i32
    return %2, %c0_i32_0 : i32, i32
  }
  func.func @transform_1(%arg0: i32, %arg1: i32) -> (i32, i32) {
    %c1_i32 = arith.constant 1 : i32
    %0 = arith.muli %arg0, %c1_i32 : i32
    %1 = arith.addi %0, %arg1 : i32
    %c0_i32 = arith.constant 0 : i32
    %2 = arith.minsi %1, %c0_i32 : i32
    %c0_i32_0 = arith.constant 0 : i32
    %c0_i32_1 = arith.constant 0 : i32
    return %2, %c0_i32_0 : i32, i32
  }
  func.func @transform_2(%arg0: i32, %arg1: i32) -> (i32, i32) {
    %c0_i32 = arith.constant 0 : i32
    %c0_i32_0 = arith.constant 0 : i32
    %c0_i32_1 = arith.constant 0 : i32
    return %c0_i32, %c0_i32_0 : i32, i32
  }
  func.func @transform_3(%arg0: i32, %arg1: i32) -> (i32, i32) {
    %c0_i32 = arith.constant 0 : i32
    %c0_i32_0 = arith.constant 0 : i32
    %c0_i32_1 = arith.constant 0 : i32
    return %c0_i32, %c0_i32_0 : i32, i32
  }
  func.func @transform_4(%arg0: i32, %arg1: i32) -> (i32, i32) {
    %c0_i32 = arith.constant 0 : i32
    %c0_i32_0 = arith.constant 0 : i32
    %c0_i32_1 = arith.constant 0 : i32
    return %c0_i32, %c0_i32_0 : i32, i32
  }
  func.func @transform_5(%arg0: i32, %arg1: i32) -> (i32, i32) {
    %c0_i32 = arith.constant 0 : i32
    %c0_i32_0 = arith.constant 0 : i32
    return %arg0, %c0_i32 : i32, i32
  }
}

</mosaic_0001>

<bundles_post_ra>
// kernel: tpu_custom_call.1
= control target key start
LH: loop header
LB: loop body
LE: loop exit
PB: predicated region body
PF: predicated region fallthrough
CT: control target
= control target key end

     0   :  { %s599_s0 = inlined_call_operand.vmem [shape: f32[16,128], index: 0, kind: input, shape index: {}]   ;;  %s600_s1 = inlined_call_operand.vmem [shape: s32[16,1], index: 1, kind: input, shape index: {}]   ;;  %s601_s2 = inlined_call_operand.vmem [shape: f32[128,20], index: 2, kind: input, shape index: {}]   ;;  %s602_s3 = inlined_call_operand.vmem [shape: f32[1,20], index: 3, kind: input, shape index: {}]   ;;  %s603_s4 = inlined_call_operand.<no memory space> [shape: f32[1,1], index: 4, kind: input, shape index: {}]   ;;  %s604_s5 = inlined_call_operand.hbm [shape: f32[1,1], index: 5, kind: output, shape index: {}]  }
   0x1   :  { %v10_v0 = vstv %s603_s4 }
   0x2   :  { %11 = vst [vmem:[#allocation2] sm:$0x1] %v10_v0 }
   0x3   :  { %v111_v1 = vld [vmem:[%s601_s2] sm:$0xff]  ;;  %v112_v2 = vld [vmem:[%s601_s2 + $0x8] sm:$0xff]  ;;  %v113_v3 = vld [vmem:[%s601_s2 + $0x10] sm:$0xff]  ;;  %v480_v6 = vmov 0  }
   0x4   :  { %v401_v4 = vpack.c.bf16 %v112_v2, %v111_v1  ;;  %v114_v5 = vld [vmem:[%s601_s2 + $0x18] sm:$0xff]  ;;  %438 = vset.pattern.permute.xlu1 %v480_v6  ;;  %439 = vset.pattern.permute.xlu0 %v480_v6  ;;  %v115_v8 = vld [vmem:[%s601_s2 + $0x20] sm:$0xff]  ;;  %v116_v9 = vld [vmem:[%s601_s2 + $0x28] sm:$0xff] }
   0x5   :  { %v405_v7 = vpack.c.bf16 %v114_v5, %v113_v3  ;;  %v409_v10 = vpack.c.bf16 %v116_v9, %v115_v8  ;;  %v117_v11 = vld [vmem:[%s601_s2 + $0x30] sm:$0xff]  ;;  %v93_v12 = vld [vmem:[%s599_s0] sm:$0xff]  ;;  %v118_v13 = vld [vmem:[%s601_s2 + $0x38] sm:$0xff] }
   0x6   :  { %402 = vmatprep.subr.bf16.mxu0 %v401_v4  ;;  %398 = vmatprep.mubr.f32.mxu0 %v93_v12  ;;  %v95_v14 = vmul.f32 %v93_v12, %v93_v12 }
   0x7   :  { %404 = vmatpush3.bf16.msra.mxu0 %v401_v4 }
   0x8   :  { %406 = vmatprep.subr.bf16.mxu0 %v405_v7 }
   0x9   :  { %v347_v15 = vld [vmem:[#allocation2] ss:$0 sm:$0xff] }
   0xa   :  { %12 = vsyncpa [#allocation4], 0  ;;  %v94_v16 = vld [vmem:[%s599_s0 + $0x8] sm:$0xff]  ;;  %238 = vperm.xlu1 %438, %v347_v15   ;;  %97 = vadd.xlane.f32.xlu0 %v95_v14  ;;  %v413_v18 = vpack.c.bf16 %v118_v13, %v117_v11  ;;  %v119_v19 = vld [vmem:[%s601_s2 + $0x40] sm:$0xff]  ;;  %vm243_vm4 = vcmask 162816   ;;  %v270_v13 = vlaneseq  ;;  %vm302_vm7 = vcmask 7168  }
   0xb   :  { %408 = vmatpush3.bf16.msra.mxu0 %v405_v7  ;;  %v96_v17 = vmul.f32 %v94_v16, %v94_v16  ;;  %v120_v20 = vld [vmem:[%s601_s2 + $0x48] sm:$0xff]  ;;  %v121_v22 = vld [vmem:[%s601_s2 + $0x50] sm:$0xff]  ;;  %v122_v23 = vld [vmem:[%s601_s2 + $0x58] sm:$0xff]  ;;  %vm91_vm8 = vcmask 0  }
   0xc   :  { %410 = vmatprep.subr.bf16.mxu0 %v409_v10  ;;  %v417_v21 = vpack.c.bf16 %v120_v20, %v119_v19  ;;  %v421_v24 = vpack.c.bf16 %v122_v23, %v121_v22  ;;  %v123_v25 = vld [vmem:[%s601_s2 + $0x60] sm:$0xff]  ;;  %v124_v26 = vld [vmem:[%s601_s2 + $0x68] sm:$0xff]  ;;  %v125_v28 = vld [vmem:[%s601_s2 + $0x70] sm:$0xff]  ;;  %v271_v15 = vand.u32 127, %v270_v13 }
   0xd   :  { %v425_v27 = vpack.c.bf16 %v124_v26, %v123_v25  ;;  %v126_v29 = vld [vmem:[%s601_s2 + $0x78] sm:$0xff]  ;;  %v346_v42 = vld [vmem:[%s602_s3] ss:$0 sm:$0xff]  ;;  %v269_v5 = vld [vmem:[%s600_s1 + $0x8] sm:$0xff] }
   0xe   :  { %99 = vadd.xlane.f32.xlu0 %v96_v17  ;;  %v429_v30 = vpack.c.bf16 %v126_v29, %v125_v28  ;;  %v268_v6 = vld [vmem:[%s600_s1] sm:$0xff]  ;;  %s482_s1 = smov [#allocation3]  }
   0xf   :  { %412 = vmatpush3.bf16.msra.mxu0 %v409_v10  ;;  %s326_s7 = sshll.u32 %s482_s1, 4  ;;  %s327_s7 = int_to_ptr.vmem [resolvable:$true] %s326_s7 }
  0x10   :  { %414 = vmatprep.subr.bf16.mxu0 %v413_v18  ;;  %s456_s9 = scalar_lea.vmem %s327_s7, 16  ;;  %s460_s10 = scalar_lea.vmem %s327_s7, 32 }
  0x11   :  { %p457_p0 = scmp.ne.s32.totalorder %s327_s7, %s456_s9  ;;  %p461_p1 = scmp.lt.s32.totalorder %s327_s7, %s327_s7 }
  0x12   :  { %p462_p2 = scmp.lt.s32.totalorder %s460_s10, %s456_s9 }
  0x13   :  { %416 = vmatpush3.bf16.msra.mxu0 %v413_v18 }
  0x14   :  { %418 = vmatprep.subr.bf16.mxu0 %v417_v21  ;;  %p463_p3 = por %p462_p2, %p461_p1 }
  0x16   :  { %p464_p4 = pnand %p463_p3, %p457_p0 }
  0x17   :  { %420 = vmatpush3.bf16.msra.mxu0 %v417_v21 }
  0x18   :  { %422 = vmatprep.subr.bf16.mxu0 %v421_v24 }
  0x1b   :  { %424 = vmatpush3.bf16.msra.mxu0 %v421_v24 }
  0x1c   :  { %426 = vmatprep.subr.bf16.mxu0 %v425_v27 }
  0x1f   :  { %428 = vmatpush3.bf16.msra.mxu0 %v425_v27 }
  0x20   :  { %430 = vmatprep.subr.bf16.mxu0 %v429_v30 }
  0x23   :  { %432 = vmatpush3.bf16.msra.mxu0 %v429_v30 }
  0x26   :  { %399 = vmatmul.mubr.f32.vlgmr.msra.gmra.mrb[0].mxu0 %v94_v16 }
  0x89   :  { %v239_v57 = vpop.permute.xlu1 %238 }
  0x97   :  { %v98_v31 = vpop.xlane.xlu0 %97 }
  0x98   :  { %v101_v34 = vmax.f32 %v98_v31, 1e-24 }
  0x9b   :  { %v100_v32 = vpop.xlane.xlu0 %99 }
  0x9c   :  { %v102_v33 = vmax.f32 %v100_v32, 1e-24 }
  0x9e   :  { %440 = vrsqrt.f32 %v102_v33 }
  0x9f   :  { %442 = vrsqrt.f32 %v101_v34 }
  0xa8   :  { %v441_v35 = vpop.eup %440 }
  0xa9   :  { %v443_v36 = vpop.eup %442  ;;  %v106_v37 = vmul.f32 %v441_v35, %v441_v35  ;;  %v110_v40 = vadd.f32 %v441_v35, %v441_v35 }
  0xaa   :  { %v105_v38 = vmul.f32 %v443_v36, %v443_v36  ;;  %v109_v44 = vadd.f32 %v443_v36, %v443_v36 }
  0xab   :  { %v108_v39 = vmul.f32 %v106_v37, %v100_v32 }
  0xac   :  { %v107_v41 = vmul.f32 %v105_v38, %v98_v31 }
  0xad   :  { %v210_v45 = vadd.f32 %v346_v42, %v108_v39 }
  0xae   :  { %v209_v48 = vadd.f32 %v346_v42, %v107_v41 }
  0xf9   :  { %v400_v43 = vpop.f32.mrb[0].mxu0 }
  0xfa   :  { %v212_v46 = vmul.f32 %v400_v43, %v110_v40  ;;  %v193_v47 = vpop.f32.mrb[1].mxu0  ;;  %v481_v40 = vmov 0.0  }
  0xfb   :  { %v211_v49 = vmul.f32 %v193_v47, %v109_v44  ;;  %92 = vst.msk [vmem:[#allocation3] sm:$0x1] %vm91_vm8, %v481_v40 }
  0xfc   :  { %v214_v50 = vsub.f32 %v210_v45, %v212_v46 }
  0xfd   :  { %v213_v51 = vsub.f32 %v209_v48, %v211_v49 }
  0xfe   :  { %v216_v52 = vmax.f32 %v214_v50, 0.0 }
  0xff   :  { %v215_v53 = vmax.f32 %v213_v51, 0.0 }
 0x100   :  { %444 = vrsqrt.f32 %v216_v52  ;;  %vm227_vm0 = vcmp.eq.f32.partialorder %v216_v52, inf  ;;  %v230_v59 = vand.u32 2147483648, %v216_v52  ;;  %vm229_vm2 = vcmp.eq.f32.partialorder %v216_v52, 0.0 }
 0x101   :  { %446 = vrsqrt.f32 %v215_v53  ;;  %vm220_vm1 = vcmp.eq.f32.partialorder %v215_v53, inf  ;;  %v223_v60 = vand.u32 2147483648, %v215_v53  ;;  %vm222_vm3 = vcmp.eq.f32.partialorder %v215_v53, 0.0 }
 0x102   :  { %v316_v48 = vld [vmem:[#allocation3] sm:$0x1] }
 0x10a   :  { %v445_v54 = vpop.eup %444 }
 0x10b   :  { %v447_v55 = vpop.eup %446  ;;  %v226_v56 = vmul.f32 %v445_v54, %v216_v52 }
 0x10c   :  { %v219_v58 = vmul.f32 %v447_v55, %v215_v53 }
 0x10d   :  { %v228_v61 = vsel %vm227_vm0, %v216_v52, %v226_v56 }
 0x10e   :  { %v221_v62 = vsel %vm220_vm1, %v215_v53, %v219_v58  ;;  %v231_v63 = vsel %vm229_vm2, %v230_v59, %v228_v61 }
 0x10f   :  { %v224_v0 = vsel %vm222_vm3, %v223_v60, %v221_v62  ;;  %v242_v1 = vmul.f32 %v239_v57, %v231_v63 }
 0x110   :  { %v241_v2 = vmul.f32 %v239_v57, %v224_v0 }
 0x111   :  { %v247_v3 = vsel %vm243_vm4, %v242_v1, -inf }
 0x112   :  { %248 = vmax.xlane.f32.xlu0 %v247_v3  ;;  %v244_v4 = vsel %vm243_vm4, %v241_v2, -inf }
 0x113   :  { %245 = vmax.xlane.f32.xlu1 %v244_v4 }
 0x124   :  { %276 = vperm.xlu1 %438, %v269_v5  }
 0x128   :  { %273 = vperm.xlu0 %439, %v268_v6  }
 0x19f   :  { %v249_v7 = vpop.xlane.xlu0 %248 }
 0x1a0   :  { %v251_v8 = vsub.f32 %v242_v1, %v249_v7  ;;  %v246_v9 = vpop.xlane.xlu1 %245 }
 0x1a1   :  { %v250_v10 = vsub.f32 %v241_v2, %v246_v9 }
 0x1a2   :  { %v254_v11 = vmul.f32 1.442695, %v251_v8 }
 0x1a3   :  { %v252_v12 = vmul.f32 1.442695, %v250_v10 }
 0x1a4   :  { %448 = vpow2.f32 %v254_v11  ;;  %v277_v18 = vpop.permute.xlu1 %276 }
 0x1a5   :  { %450 = vpow2.f32 %v252_v12  ;;  %vm279_vm6 = vcmp.eq.s32.totalorder %v271_v15, %v277_v18 }
 0x1a6   :  { %v281_v23 = vsel %vm279_vm6, %v242_v1, 0.0 }
 0x1a7   :  { %v274_v14 = vpop.permute.xlu0 %273  ;;  %v285_v24 = vsel %vm243_vm4, %v281_v23, 0.0 }
 0x1a8   :  { %vm278_vm5 = vcmp.eq.s32.totalorder %v271_v15, %v274_v14 }
 0x1a9   :  { %v280_v21 = vsel %vm278_vm5, %v241_v2, 0.0 }
 0x1aa   :  { %v282_v22 = vsel %vm243_vm4, %v280_v21, 0.0 }
 0x1ae   :  { %v449_v16 = vpop.eup %448 }
 0x1af   :  { %v451_v17 = vpop.eup %450  ;;  %v259_v19 = vsel %vm243_vm4, %v449_v16, 0.0 }
 0x1b0   :  { %260 = vadd.xlane.f32.xlu1 %v259_v19  ;;  %v256_v20 = vsel %vm243_vm4, %v451_v17, 0.0 }
 0x1b1   :  { %257 = vadd.xlane.f32.xlu0 %v256_v20 }
 0x1b5   :  { %283 = vadd.xlane.f32.xlu0 %v282_v22 }
 0x1b9   :  { %286 = vadd.xlane.f32.xlu0 %v285_v24 }
 0x23d   :  { %v261_v25 = vpop.xlane.xlu1 %260 }
 0x23e   :  { %452 = vlog2.f32 %v261_v25  ;;  %v258_v26 = vpop.xlane.xlu0 %257 }
 0x23f   :  { %454 = vlog2.f32 %v258_v26 }
 0x242   :  { %v284_v27 = vpop.xlane.xlu0 %283 }
 0x246   :  { %v287_v34 = vpop.xlane.xlu0 %286 }
 0x248   :  { %v453_v28 = vpop.eup %452 }
 0x249   :  { %v455_v29 = vpop.eup %454  ;;  %v265_v30 = vmul.f32 0.6931472, %v453_v28 }
 0x24a   :  { %v263_v31 = vmul.f32 0.6931472, %v455_v29 }
 0x24b   :  { %v267_v32 = vadd.f32 %v265_v30, %v249_v7 }
 0x24c   :  { %v266_v33 = vadd.f32 %v263_v31, %v246_v9 }
 0x24d   :  { %v289_v35 = vsub.f32 %v267_v32, %v287_v34 }
 0x24e   :  { %v288_v36 = vsub.f32 %v266_v33, %v284_v27 }
 0x24f   :  { %v304_v37 = vsel %vm302_vm7, %v289_v35, 0.0 }
 0x250   :  { %v303_v38 = vsel %vm302_vm7, %v288_v36, 0.0 }
 0x251   :  { %v305_v39 = vadd.f32 %v304_v37, %v303_v38 }
 0x253   :  { %306 = vadd.xlane.f32.xlu1 %v305_v39 }
 0x2e0   :  { %v307_v41 = vpop.xlane.xlu1 %306 }
 0x2e1   :  { %v308_v42 = vrot.slane %v307_v41, 4 }
 0x2e3   :  { %v309_v43 = vadd.f32 %v308_v42, %v307_v41 }
 0x2e5   :  { %v310_v44 = vrot.slane %v309_v43, 2 }
 0x2e7   :  { %v311_v45 = vadd.f32 %v310_v44, %v309_v43 }
 0x2e9   :  { %v312_v46 = vrot.slane %v311_v45, 1 }
 0x2eb   :  { %v313_v47 = vadd.f32 %v312_v46, %v311_v45 }
 0x2ed   :  { %433 = vpush %v313_v47 }
 0x31e   :  { %s434_s8 = spop %433 }
 0x31f   :  { %v315_v49 = vstv %s434_s8 }
 0x320   :  { %v317_v50 = vadd.f32 %v316_v48, %v315_v49 }
 0x322   :  { %319 = vst.msk [vmem:[#allocation3] sm:$0x1] %vm91_vm8, %v317_v50 }
 0x323   :  { %467 = shalt.err (!%p464_p4)
}
 0x324   :  { %s468_s13 = scalar_lea.hbm %s604_s5, 16 }
 0x325   :  { %p469_p5 = scmp.ne.s32.totalorder %s604_s5, %s468_s13  ;;  %p472_p6 = scmp.lt.u32.totalorder %s468_s13, %s604_s5 }
 0x327   :  { %p474_p7 = pnand %p472_p6, %p469_p5 }
 0x329   :  { %477 = shalt.err (!%p474_p7)
}
 0x32a   :  { %329 = dma.vmem_to_hbm [thread:$0]  %s327_s7, 16, %s604_s5, [#allocation4]  }
 0x32b   :  { %478 = dma.done.wait [#allocation4], 16  }
 0x32c   :  { %479 = vsyncadd [#allocation4], 4294967280 }
 0x32d   :  { %333 = vsyncpa [#allocation4], 1 }

</bundles_post_ra>
